<compile_context>
chip_gen: v7x
topology: tpu7x:2x2x1
jax: 0.10.0
libtpu: 0.0.40
codegen_flags: <defaults>
</compile_context>

<pallas_src>
import jax
import jax.numpy as jnp
from jax.experimental import pallas as pl
from jax.experimental.pallas import tpu as pltpu


def _round_up(x, m):
    return (x + m - 1) // m * m


def _cdiv(a, b):
    return (a + b - 1) // b


def _largest_aligned_divisor(dim, max_tile, granule=128):
    """Largest multiple of `granule` that divides `dim` and is <= max_tile."""
    t = (min(max_tile, dim) // granule) * granule
    while t > granule:
        if dim % t == 0:
            return t
        t -= granule
    return granule


def _linear_kernel(x_ref, w_ref, b_ref, o_ref):
    # x tile: (tm, tk); w tile: (tk, tn) (pre-transposed); bias tile: (1, tn).
    # o_ref (f32) is resident in VMEM across the K grid axis and doubles as the
    # accumulator, so there is no scratch, no zero-fill and no final copy.
    part = jnp.dot(x_ref[...], w_ref[...], preferred_element_type=jnp.float32)

    @pl.when(pl.program_id(2) == 0)
    def _init():
        o_ref[...] = part + b_ref[...]

    @pl.when(pl.program_id(2) > 0)
    def _accumulate():
        o_ref[...] += part


def projection_layer(x, weight, bias, *, tm_max=512, tn_max=512, tk_max=1024):
    """y = x @ weight.T + bias (torch.nn.Linear semantics) via Pallas TPU.

    Args:
      x:      (..., input_dim)
      weight: (output_dim, input_dim)   (PyTorch Linear convention)
      bias:   (output_dim,)
    Returns:
      (..., output_dim)
    """
    *lead, input_dim = x.shape
    output_dim, k_w = weight.shape
    assert k_w == input_dim, "weight shape must be (output_dim, input_dim)"
    assert bias.shape == (output_dim,)

    m = 1
    for d in lead:
        m *= d
    x2d = x.reshape(m, input_dim)

    # ---- Lane-dim padding only (M handled via partial blocks / masked store). ----
    k_pad = _round_up(input_dim, 128)
    n_pad = _round_up(output_dim, 128)

    if k_pad != input_dim:
        # K padding must be explicit zeros: padded K lanes join the reduction.
        x2d = jnp.pad(x2d, ((0, 0), (0, k_pad - input_dim)))

    w_t = weight.T  # (K, N); one-time op, constant-folded for static params.
    if (k_pad, n_pad) != (input_dim, output_dim):
        w_t = jnp.pad(w_t, ((0, k_pad - input_dim), (0, n_pad - output_dim)))

    b2d = bias.reshape(1, output_dim)
    if n_pad != output_dim:
        b2d = jnp.pad(b2d, ((0, 0), (0, n_pad - output_dim)))

    # ---- Tile selection (128-granular N/K tiles; tm is 8-granular). ----
    tk = _largest_aligned_divisor(k_pad, tk_max)
    tn = _largest_aligned_divisor(n_pad, tn_max)
    tm = min(tm_max, _round_up(m, 8))

    grid_m = _cdiv(m, tm)
    grid_n = n_pad // tn
    # Keep >= 2 blocks on a parallel axis so both v7x TensorCores get work.
    if grid_m == 1 and grid_n == 1 and m >= 16:
        tm = _round_up(_cdiv(m, 2), 8)
        grid_m = _cdiv(m, tm)
    grid = (grid_m, grid_n, k_pad // tk)

    # ---- Explicit VMEM budget: double-buffered inputs + double-buffered out. ----
    need = (2 * (tm * tk * x2d.dtype.itemsize
                 + tk * tn * w_t.dtype.itemsize
                 + tn * 4)
            + 2 * tm * tn * 4)
    vmem_limit = min(64 * 1024 * 1024, max(32 * 1024 * 1024, int(need * 1.5)))

    out2d = pl.pallas_call(
        _linear_kernel,
        out_shape=jax.ShapeDtypeStruct((m, n_pad), jnp.float32),
        grid_spec=pltpu.PrefetchScalarGridSpec(
            num_scalar_prefetch=0,
            grid=grid,
            in_specs=[
                pl.BlockSpec((tm, tk), lambda i, j, k: (i, k)),   # x tile
                pl.BlockSpec((tk, tn), lambda i, j, k: (k, j)),   # w.T tile
                pl.BlockSpec((1, tn), lambda i, j, k: (0, j)),    # bias tile
            ],
            out_specs=pl.BlockSpec((tm, tn), lambda i, j, k: (i, j)),
        ),
        compiler_params=pltpu.CompilerParams(
            dimension_semantics=("parallel", "parallel", "arbitrary"),
            vmem_limit_bytes=vmem_limit),
        cost_estimate=pl.CostEstimate(
            flops=2 * m * output_dim * input_dim,
            bytes_accessed=(x.dtype.itemsize * m * input_dim
                            + weight.dtype.itemsize * output_dim * input_dim
                            + 4 * m * output_dim + 4 * output_dim),
            transcendentals=0),
    )(x2d, w_t, b2d)

    out2d = out2d[:, :output_dim]
    out_dtype = jnp.promote_types(x.dtype, weight.dtype)
    return out2d.reshape(*lead, output_dim).astype(out_dtype)


if __name__ == "__main__":
    # Small, deterministic setup consistent with the module's forward.
    batch, seq, input_dim, output_dim = 2, 8, 32, 16

    key = jax.random.PRNGKey(0)
    kx, kw, kb = jax.random.split(key, 3)

    x = jax.random.normal(kx, (batch, seq, input_dim), dtype=jnp.float32)
    bound = 1.0 / jnp.sqrt(jnp.float32(input_dim))
    weight = jax.random.uniform(kw, (output_dim, input_dim),
                                minval=-bound, maxval=bound, dtype=jnp.float32)
    bias = jax.random.uniform(kb, (output_dim,),
                              minval=-bound, maxval=bound, dtype=jnp.float32)

    out = projection_layer(x, weight, bias)
    jax.block_until_ready(out)
    ref = x @ weight.T + bias
    assert out.shape == (batch, seq, output_dim)
    assert jnp.allclose(out, ref, atol=1e-5, rtol=1e-5)

    # Multi-tile path: partial last M block (masked store) + padded N, aligned K.
    kx2, kw2, kb2 = jax.random.split(jax.random.PRNGKey(1), 3)
    x2 = jax.random.normal(kx2, (3, 300, 384), dtype=jnp.float32)
    w2 = jax.random.normal(kw2, (200, 384), dtype=jnp.float32) * 0.05
    b2 = jax.random.normal(kb2, (200,), dtype=jnp.float32) * 0.05
    out2 = projection_layer(x2, w2, b2)
    jax.block_until_ready(out2)
    ref2 = x2 @ w2.T + b2
    assert jnp.allclose(out2, ref2, atol=1e-4, rtol=1e-4)

    # Unaligned-K path (explicit zero K padding) + M-split heuristic + padded N.
    kx3, kw3, kb3 = jax.random.split(jax.random.PRNGKey(2), 3)
    x3 = jax.random.normal(kx3, (2, 50, 200), dtype=jnp.float32)
    w3 = jax.random.normal(kw3, (96, 200), dtype=jnp.float32) * 0.05
    b3 = jax.random.normal(kb3, (96,), dtype=jnp.float32) * 0.05
    out3 = projection_layer(x3, w3, b3)
    jax.block_until_ready(out3)
    ref3 = x3 @ w3.T + b3
    assert jnp.allclose(out3, ref3, atol=1e-4, rtol=1e-4)

    print("KERNEL_OK")
</pallas_src>

<mosaic_0001>
module attributes {stable_mosaic.version = 11 : i64} {
  func.func @_linear_kernel(%arg0: i32, %arg1: i32, %arg2: i32, %arg3: memref<8x128xf32, #tpu.memory_space<vmem>>, %arg4: memref<128x128xf32, #tpu.memory_space<vmem>>, %arg5: memref<1x128xf32, #tpu.memory_space<vmem>>, %arg6: memref<8x128xf32, #tpu.memory_space<vmem>>) attributes {dimension_semantics = [#tpu.dimension_semantics<parallel>, #tpu.dimension_semantics<parallel>, #tpu.dimension_semantics<arbitrary>], iteration_bounds = array<i64: 2, 1, 1>, scalar_prefetch = 0 : i64, scratch_operands = 0 : i64, tpu.core_type = #tpu.core_type<tc>, window_params = [{transform_indices = @transform_0, window_bounds = array<i64: 8, 128>}, {transform_indices = @transform_1, window_bounds = array<i64: 128, 128>}, {transform_indices = @transform_2, window_bounds = array<i64: 1, 128>}, {transform_indices = @transform_3, window_bounds = array<i64: 8, 128>}]} {
    %c0 = arith.constant 0 : index
    %c0_0 = arith.constant 0 : index
    %0 = vector.load %arg3[%c0, %c0_0] : memref<8x128xf32, #tpu.memory_space<vmem>>, vector<8x128xf32>
    %c0_1 = arith.constant 0 : index
    %c0_2 = arith.constant 0 : index
    %1 = vector.load %arg4[%c0_1, %c0_2] : memref<128x128xf32, #tpu.memory_space<vmem>>, vector<128x128xf32>
    %cst = arith.constant dense<0.000000e+00> : vector<8x128xf32>
    %2 = tpu.matmul %0, %1, %cst {dimension_numbers = #tpu.dot_dimension_numbers<[1], [0], [0], [1], [0, 0, 1, 1], [], []>} : vector<8x128xf32>, vector<128x128xf32>, vector<8x128xf32> -> vector<8x128xf32>
    %c0_i32 = arith.constant 0 : i32
    %3 = arith.cmpi eq, %arg2, %c0_i32 : i32
    %4 = arith.extui %3 : i1 to i32
    %c0_i32_3 = arith.constant 0 : i32
    %5 = arith.cmpi ne, %4, %c0_i32_3 : i32
    scf.if %5 {
      %c0_6 = arith.constant 0 : index
      %c0_7 = arith.constant 0 : index
      %9 = vector.load %arg5[%c0_6, %c0_7] : memref<1x128xf32, #tpu.memory_space<vmem>>, vector<1x128xf32>
      %10 = vector.broadcast %9 : vector<1x128xf32> to vector<8x128xf32>
      %11 = arith.addf %2, %10 : vector<8x128xf32>
      %c0_8 = arith.constant 0 : index
      %c0_9 = arith.constant 0 : index
      %12 = vector.load %arg6[%c0_8, %c0_9] : memref<8x128xf32, #tpu.memory_space<vmem>>, vector<8x128xf32>
      tpu.vector_store %arg6[%c0_8, %c0_9], %11 {strides = array<i32>} : memref<8x128xf32, #tpu.memory_space<vmem>>, vector<8x128xf32>,
    } else {
    }
    %c0_i32_4 = arith.constant 0 : i32
    %6 = arith.cmpi sgt, %arg2, %c0_i32_4 : i32
    %7 = arith.extui %6 : i1 to i32
    %c0_i32_5 = arith.constant 0 : i32
    %8 = arith.cmpi ne, %7, %c0_i32_5 : i32
    scf.if %8 {
      %c0_6 = arith.constant 0 : index
      %c0_7 = arith.constant 0 : index
      %9 = vector.load %arg6[%c0_6, %c0_7] : memref<8x128xf32, #tpu.memory_space<vmem>>, vector<8x128xf32>
      %10 = arith.addf %9, %2 : vector<8x128xf32>
      %c0_8 = arith.constant 0 : index
      %c0_9 = arith.constant 0 : index
      %11 = vector.load %arg6[%c0_8, %c0_9] : memref<8x128xf32, #tpu.memory_space<vmem>>, vector<8x128xf32>
      tpu.vector_store %arg6[%c0_8, %c0_9], %10 {strides = array<i32>} : memref<8x128xf32, #tpu.memory_space<vmem>>, vector<8x128xf32>,
    } else {
    }
    return
  }
  func.func @transform_0(%arg0: i32, %arg1: i32, %arg2: i32) -> (i32, i32) {
    %c0_i32 = arith.constant 0 : i32
    return %arg0, %arg2 : i32, i32
  }
  func.func @transform_1(%arg0: i32, %arg1: i32, %arg2: i32) -> (i32, i32) {
    %c0_i32 = arith.constant 0 : i32
    return %arg2, %arg1 : i32, i32
  }
  func.func @transform_2(%arg0: i32, %arg1: i32, %arg2: i32) -> (i32, i32) {
    %c0_i32 = arith.constant 0 : i32
    %c0_i32_0 = arith.constant 0 : i32
    return %c0_i32, %arg1 : i32, i32
  }
  func.func @transform_3(%arg0: i32, %arg1: i32, %arg2: i32) -> (i32, i32) {
    %c0_i32 = arith.constant 0 : i32
    return %arg0, %arg1 : i32, i32
  }
}

</mosaic_0001>

<bundles_post_ra>
// kernel: tpu_custom_call.1
= control target key start
LH: loop header
LB: loop body
LE: loop exit
PB: predicated region body
PF: predicated region fallthrough
CT: control target
= control target key end

     0   :  { %8 = vsyncpa [#allocation3], 0  ;;  %s1051_s0 = inlined_call_operand.hbm [shape: f32[16,128], index: 0, kind: input, shape index: {}]   ;;  %s1052_s1 = inlined_call_operand.hbm [shape: f32[128,128], index: 1, kind: input, shape index: {}]   ;;  %s1053_s2 = inlined_call_operand.vmem [shape: f32[1,128], index: 2, kind: input, shape index: {}]   ;;  %s1054_s3 = inlined_call_operand.hbm [shape: f32[16,128], index: 3, kind: output, shape index: {}]  }
   0x1   :  { %10 = vsyncpa [#allocation3 + $0x1], 0 }
   0x2   :  { %11 = vsyncpa [#allocation6], 0 }
   0x3   :  { %12 = vsyncpa [#allocation4], 0 }
   0x4   :  { %14 = vsyncpa [#allocation4 + $0x1], 0  ;;  %s827_s12 = smov 0   ;;  %s829_s13 = smov 0  }
   0x5   :  { %s831_s14 = smov 0   ;;  %s833_s15 = smov 0  }
   0x6   :  { %s835_s16 = smov 0   ;;  %s837_s17 = smov 0  }
   0x7 LB: > { %s482_s18 = sadd.s32 4294967295, %s797_s17   ;;  %s483_s19 = sadd.s32 4294967294, %s797_s17   ;;  %s797_s17 = sphi %s837_s17, %s20_s17   ;;  %s793_s16 = sphi %s835_s16, %s1078_s16   ;;  %s789_s15 = sphi %s833_s15, %s1077_s15   ;;  %s785_s14 = sphi %s831_s14, %s1076_s14   ;;  %s781_s13 = sphi %s829_s13, %s1075_s13   ;;  %s777_s12 = sphi %s827_s12, %s1074_s12  }
   0x8   : > { %p61_p0 = scmp.ne.s32.totalorder %s781_s13, %s777_s12  ;;  %p861_p1 = scmp.eq.s32.totalorder %s482_s18, 0 }
   0x9   : > { %p865_p2 = scmp.eq.s32.totalorder %s482_s18, 1  ;;  %p147_p3 = scmp.eq.s32.totalorder %s483_s19, 1 }
   0xa   : > { %s1059_s20 = scalar_select %p861_p1, 1, 0 }
   0xb   : > { %s1060_s21 = scalar_select %p865_p2, 1, 0 }
   0xc   : > { %p871_p4 = por %p861_p1, %p61_p0  ;;  %p484_p5 = scmp.ge.s32.totalorder %s797_s17, 1 }
   0xd   : > { %p876_p6 = por %p147_p3, %p61_p0  ;;  %p154_p7 = scmp.lt.s32.totalorder %s797_s17, 3 }
   0xe   : > { %s1061_s22 = scalar_select %p871_p4, 1, 0 }
   0xf   : > { %s1062_s23 = scalar_select %p876_p6, 1, 0 }
  0x10   : > { %p881_p8 = pnand %p484_p5, %p154_p7  ;;  %s799_s25 = smov [#allocation5]  }
  0x11   : > { %s170_s26 = sshll.u32 %s799_s25, 4  ;;  %s39_s28 = sadd.s32 1, %s793_s16  ;;  %s171_s26 = int_to_ptr.vmem [resolvable:$true] %s170_s26 }
  0x12   : > { %s1063_s24 = scalar_select %p881_p8, 1, 0 }
  0x13   : > { %p583_p9 = pneg %p881_p8  ;;  %s653_s4 = scalar_lea.hbm %s1052_s1, 2048 }
  0x14   : > { %p654_p12 = scmp.ne.s32.totalorder %s1052_s1, %s653_s4  ;;  %p660_p5 = scmp.lt.u32.totalorder %s653_s4, %s1052_s1 }
  0x15   : > { %p890_p11 = pnand %p583_p9, %p861_p1 }
  0x17   : > { %p655_p13 = pneg %p890_p11 }
  0x19   : > { %p656_p0 = pnand %p655_p13, %p654_p12 }
  0x1b   : > { %p657_p3 = pneg %p656_p0 }
  0x1d   : > { %p662_p7 = pnand %p660_p5, %p657_p3 }
  0x1f   : > { %665 = shalt.err (!%p662_p7)
}
  0x20   : > { %s666_s9 = scalar_lea.vmem %s171_s26, 2048  ;;  %p674_p1 = scmp.lt.s32.totalorder %s171_s26, %s171_s26 }
  0x21   : > { %p667_p9 = scmp.ne.s32.totalorder %s171_s26, %s666_s9  ;;  %p675_p4 = scmp.lt.s32.totalorder %s666_s9, %s666_s9 }
  0x23   : > { %p669_p10 = pnand %p667_p9, %p655_p13  ;;  %p676_p8 = por %p675_p4, %p674_p1 }
  0x25   : > { %p670_p6 = pneg %p669_p10 }
  0x27   : > { %p677_p2 = pnand %p676_p8, %p670_p6 }
  0x29   : > { %680 = shalt.err (!%p677_p2)
}
  0x2a   : > { %s800_s10 = smov 128   ;;  %s801_s11 = smov 8  }
  0x2b   : > { %586 = dma.hbm_to_vmem [thread:$0]  (!%p890_p11), %s1052_s1, 2048, %s171_s26, [#allocation6], %s800_s10, %s800_s10, %s801_s11  }
  0x2c   : > { %p41_p1 = scmp.ge.s32.totalorder %s39_s28, 2  ;;  %s48_s25 = sadd.s32 1, %s785_s14 }
  0x2d   : > { %p55_p2 = scmp.ne.s32.totalorder %s785_s14, %s781_s13  ;;  %p56_p4 = scmp.eq.s32.totalorder %s797_s17, 0 }
  0x2e   : > { %s1080_s28 = smov (%p41_p1, %s39_s28), 0  ;;  %p1066_p8 = scmp.ne.s32.totalorder %s1060_s21, 0 }
  0x2f   : > { %p917_p6 = por %p56_p4, %p55_p2  ;;  %s43_s27 = ssub.s32 %s793_s16, %s1080_s28 }
  0x30   : > { %p923_p10 = por %p1066_p8, %p55_p2  ;;  %p596_p12 = scmp.lt.s32.totalorder %s797_s17, 2 }
  0x31   : > { %p46_p11 = scmp.eq.s32.totalorder %s43_s27, 0  ;;  %s190_s26 = sand.u32 1, %s785_s14  }
  0x32   : > { %s488_s4 = sshll.u32 %s190_s26, 3  ;;  %s489_s6 = sshll.u32 %s793_s16, 7 }
  0x33   : > { %s932_s5 = scalar_select %p46_p11, %s785_s14, %s48_s25  }
  0x34   : > { %s938_s9 = scalar_lea.hbm %s1051_s0, %s489_s6  ;;  %s194_s21 = scalar_lea.vmem [#allocation2], %s488_s4 }
  0x35   : > { %s202_s10 = sshll.u32 %s194_s21, 4  ;;  %p944_p13 = pnand %p596_p12, %p917_p6  ;;  %s940_s10 = int_to_ptr.vmem [resolvable:$true] %s202_s10 }
  0x36   : > { %s191_s18 = scalar_lea.sflag [#allocation3], %s190_s26  ;;  %s681_s19 = scalar_lea.hbm %s938_s9, 128 }
  0x37   : > { %p682_p0 = scmp.ne.s32.totalorder %s938_s9, %s681_s19  ;;  %p683_p3 = pneg %p944_p13 }
  0x38   : > { %s686_s4 = scalar_lea.hbm %s1051_s0, 256  ;;  %p687_p9 = scmp.lt.u32.totalorder %s938_s9, %s1051_s0 }
  0x39   : > { %p684_p5 = pnand %p683_p3, %p682_p0  ;;  %p688_p1 = scmp.lt.u32.totalorder %s686_s4, %s681_s19 }
  0x3a   : > { %p690_p4 = scmp.lt.u32.totalorder %s681_s19, %s938_s9 }
  0x3b   : > { %p685_p7 = pneg %p684_p5  ;;  %p689_p2 = por %p688_p1, %p687_p9 }
  0x3d   : > { %p691_p6 = por %p690_p4, %p689_p2 }
  0x3f   : > { %p692_p8 = pnand %p691_p6, %p685_p7 }
  0x41   : > { %695 = shalt.err (!%p692_p8)
}
  0x42   : > { %s696_s26 = scalar_lea.vmem %s940_s10, 128  ;;  %s802_s7 = smov [#allocation2]  }
  0x43   : > { %p697_p12 = scmp.ne.s32.totalorder %s940_s10, %s696_s26  ;;  %s701_s8 = sshll.u32 %s802_s7, 4  ;;  %s702_s8 = int_to_ptr.vmem [resolvable:$false] %s701_s8 }
  0x44   : > { %s703_s21 = scalar_lea.vmem %s702_s8, 256  ;;  %p704_p5 = scmp.lt.s32.totalorder %s940_s10, %s702_s8 }
  0x45   : > { %p699_p11 = pnand %p697_p12, %p683_p3  ;;  %p705_p9 = scmp.lt.s32.totalorder %s703_s21, %s696_s26 }
  0x47   : > { %p700_p0 = pneg %p699_p11  ;;  %p706_p1 = por %p705_p9, %p704_p5 }
  0x49   : > { %p707_p2 = pnand %p706_p1, %p700_p0 }
  0x4b   : > { %710 = shalt.err (!%p707_p2)
}
  0x4c   : > { %590 = dma.hbm_to_vmem [thread:$0]  (!%p944_p13), %s938_s9, 128, %s940_s10, %s191_s18  }
  0x4d   : > { %p1069_p7 = scmp.ne.s32.totalorder %s1063_s24, 0 }
  0x4e   : > { %s976_s19 = sand.u32 (!%p1069_p7), 1, %s781_s13   ;;  %p1070_p3 = scmp.ne.s32.totalorder (!%p1069_p7), %s1061_s22, 0 }
  0x4f   : > { %211 = sbr.rel (%p1069_p7) target bundleno = 353 (0x161), region = 32  ;;  %s491_s25 = sshll.u32 (!%p1069_p7), %s976_s19, 3 }
  0x50   : > { %s214_s27 = scalar_lea.sflag (!%p1069_p7), [#allocation3], %s976_s19  ;;  %s982_s4 = scalar_lea.vmem (!%p1069_p7), [#allocation2], %s491_s25 }
  0x56   : > { %764 = dma.done.wait (%p1070_p3), %s214_s27, 128  }
  0x57   : > { %766 = vsyncadd (%p1070_p3), %s214_s27, 4294967168  ;;  %p1071_p13 = scmp.ne.s32.totalorder %s1059_s20, 0 }
  0x59   : > { %768 = dma.done.wait (%p1071_p13), [#allocation6], 2048  }
  0x5a   : > { %770 = vsyncadd (%p1071_p13), [#allocation6], 4294965248  ;;  %v803_v0 = vmov 0.0|0.0   ;;  %vm804_vm0 = vmmov 0   ;;  %v805_v1 = vmov 0.0   ;;  %v252_v2 = vld [vmem:[#allocation5] sm:$0xff] }
  0x5b   : > { %551 = vmatprep.subr.bf16.mxu0 %v803_v0  ;;  %548 = vmatprep.mubr.msk.f32.mxu0 %vm804_vm0, %v805_v1  ;;  %v253_v3 = vld [vmem:[#allocation5 + $0x8] sm:$0xff]  ;;  %v254_v4 = vld [vmem:[#allocation5 + $0x10] sm:$0xff]  ;;  %v255_v6 = vld [vmem:[#allocation5 + $0x18] sm:$0xff]  ;;  %s496_s24 = sshll.u32 %s789_s15, 7  ;;  %s246_s9 = scalar_lea.vmem [#allocation7], %s491_s25 }
  0x5c   : > { %v552_v5 = vpack.c.bf16 %v253_v3, %v252_v2  ;;  %v555_v7 = vpack.c.bf16 %v255_v6, %v254_v4  ;;  %v256_v8 = vld [vmem:[#allocation5 + $0x20] sm:$0xff]  ;;  %v257_v9 = vld [vmem:[#allocation5 + $0x28] sm:$0xff]  ;;  %v258_v11 = vld [vmem:[#allocation5 + $0x30] sm:$0xff]  ;;  %s373_s10 = sshll.u32 %s246_s9, 4  ;;  %s1002_s29 = scalar_lea.hbm %s1054_s3, %s496_s24  ;;  %s1004_s10 = int_to_ptr.vmem [resolvable:$true] %s373_s10 }
  0x5d   : > { %v558_v10 = vpack.c.bf16 %v257_v9, %v256_v8  ;;  %v259_v12 = vld [vmem:[#allocation5 + $0x38] sm:$0xff]  ;;  %v260_v14 = vld [vmem:[#allocation5 + $0x40] sm:$0xff]  ;;  %v261_v15 = vld [vmem:[#allocation5 + $0x48] sm:$0xff]  ;;  %s359_s6 = scalar_lea.sflag [#allocation4], %s976_s19  ;;  %s711_s26 = scalar_lea.vmem %s1004_s10, 128 }
  0x5e   : > { %553 = vmatpush3.bf16.msra.mxu0 %v552_v5  ;;  %v561_v13 = vpack.c.bf16 %v259_v12, %v258_v11  ;;  %v564_v16 = vpack.c.bf16 %v261_v15, %v260_v14  ;;  %v262_v17 = vld [vmem:[#allocation5 + $0x50] sm:$0xff]  ;;  %v263_v18 = vld [vmem:[#allocation5 + $0x58] sm:$0xff]  ;;  %v264_v20 = vld [vmem:[#allocation5 + $0x60] sm:$0xff]  ;;  %p712_p4 = scmp.ne.s32.totalorder %s1004_s10, %s711_s26  ;;  %s806_s15 = smov [#allocation7]  }
  0x5f   : > { %554 = vmatprep.subr.bf16.mxu0 %v803_v0  ;;  %v567_v19 = vpack.c.bf16 %v263_v18, %v262_v17  ;;  %v265_v21 = vld [vmem:[#allocation5 + $0x68] sm:$0xff]  ;;  %v266_v23 = vld [vmem:[#allocation5 + $0x70] sm:$0xff]  ;;  %v267_v24 = vld [vmem:[#allocation5 + $0x78] sm:$0xff]  ;;  %s715_s7 = sshll.u32 %s806_s15, 4  ;;  %s716_s7 = int_to_ptr.vmem [resolvable:$false] %s715_s7 }
  0x60   : > { %v570_v22 = vpack.c.bf16 %v265_v21, %v264_v20  ;;  %v573_v25 = vpack.c.bf16 %v267_v24, %v266_v23  ;;  %v251_v26 = vld [vmem:[%s982_s4] sm:$0xff]  ;;  %p713_p6 = pnand %p712_p4, %p923_p10  ;;  %s717_s8 = scalar_lea.vmem %s716_s7, 256 }
  0x61   : > { %v494_v27 = vld [vmem:[%s1053_s2] ss:$0 sm:$0xff]  ;;  %p718_p12 = scmp.lt.s32.totalorder %s1004_s10, %s716_s7  ;;  %p719_p11 = scmp.lt.s32.totalorder %s717_s8, %s711_s26 }
  0x62   : > { %556 = vmatpush3.bf16.msra.mxu0 %v555_v7  ;;  %p714_p8 = pneg %p713_p6 }
  0x63   : > { %557 = vmatprep.subr.bf16.mxu0 %v803_v0  ;;  %p720_p0 = por %p719_p11, %p718_p12 }
  0x65   : > { %p721_p5 = pnand %p720_p0, %p714_p8 }
  0x66   : > { %559 = vmatpush3.bf16.msra.mxu0 %v558_v10 }
  0x67   : > { %560 = vmatprep.subr.bf16.mxu0 %v803_v0 }
  0x6a   : > { %562 = vmatpush3.bf16.msra.mxu0 %v561_v13 }
  0x6b   : > { %563 = vmatprep.subr.bf16.mxu0 %v803_v0 }
  0x6e   : > { %565 = vmatpush3.bf16.msra.mxu0 %v564_v16 }
  0x6f   : > { %566 = vmatprep.subr.bf16.mxu0 %v803_v0 }
  0x72   : > { %568 = vmatpush3.bf16.msra.mxu0 %v567_v19 }
  0x73   : > { %569 = vmatprep.subr.bf16.mxu0 %v803_v0 }
  0x76   : > { %571 = vmatpush3.bf16.msra.mxu0 %v570_v22 }
  0x77   : > { %572 = vmatprep.subr.bf16.mxu0 %v803_v0 }
  0x7a   : > { %574 = vmatpush3.bf16.msra.mxu0 %v573_v25 }
  0x7d   : > { %549 = vmatmul.mubr.f32.vlgmr.msra.gmra.mrb[0].mxu0 %v251_v26 }
 0x150   : > { %v334_v28 = vpop.f32.mrb[0].mxu0 }
 0x151   : > { %v349_v29 = vadd.f32 %v494_v27, %v334_v28  ;;  %v550_v30 = vpop.f32.mrb[1].mxu0 }
 0x153   : > { %350 = vst [vmem:[%s246_s9] sm:$0xff] %v349_v29 }
 0x154   : > { %724 = shalt.err (!%p721_p5)
}
 0x155   : > { %s725_s21 = scalar_lea.hbm %s1002_s29, 128  ;;  %s729_s27 = scalar_lea.hbm %s1054_s3, 256 }
 0x156   : > { %p726_p9 = scmp.ne.s32.totalorder %s1002_s29, %s725_s21  ;;  %p730_p7 = scmp.lt.u32.totalorder %s1002_s29, %s1054_s3 }
 0x157   : > { %p731_p3 = scmp.lt.u32.totalorder %s729_s27, %s725_s21  ;;  %p733_p4 = scmp.lt.u32.totalorder %s725_s21, %s1002_s29 }
 0x158   : > { %p727_p1 = pnand %p726_p9, %p923_p10 }
 0x159   : > { %p732_p13 = por %p731_p3, %p730_p7 }
 0x15a   : > { %p728_p2 = pneg %p727_p1 }
 0x15b   : > { %p734_p6 = por %p733_p4, %p732_p13 }
 0x15d   : > { %p735_p8 = pnand %p734_p6, %p728_p2 }
 0x15f   : > { %738 = shalt.err (!%p735_p8)
}
 0x160   : > { %581 = dma.vmem_to_hbm [thread:$0]  (%p923_p10), %s1004_s10, 128, %s1002_s29, %s359_s6  }
 0x161 PF: > { %s385_s22 = sand.u32 1, %s777_s12   ;;  %p1072_p12 = scmp.ne.s32.totalorder %s1062_s23, 0 }
 0x162   : > { %p1073_p11 = scmp.ge.s32.totalorder %s797_s17, 2  ;;  %s386_s24 = scalar_lea.sflag [#allocation4], %s385_s22 }
 0x164   : > { %p592_p0 = pnand %p1073_p11, %p1072_p12 }
 0x166   : > { %772 = dma.done.wait (!%p592_p0), %s386_s24, 128  }
 0x167   : > { %774 = vsyncadd (!%p592_p0), %s386_s24, 4294967168  ;;  %s20_s17 = sadd.s32 1, %s797_s17   ;;  %s1074_s12 = smov %s781_s13 }
 0x168   : > { %p17_p5 = scmp.ge.s32.totalorder %s20_s17, 4   ;;  %s1075_s13 = smov %s785_s14 }
 0x169   : > { %s1076_s14 = smov %s932_s5  ;;  %s1077_s15 = smov %s793_s16 }
 0x16a   : > { %s1078_s16 = smov %s1080_s28  ;;  %19 = sbr.rel (!%p17_p5) target bundleno = 7 (0x7), region = 93 }
 0x171   :  { %391 = vsyncpa [#allocation3], 1 }
 0x172   :  { %393 = vsyncpa [#allocation3 + $0x1], 1 }
 0x173   :  { %394 = vsyncpa [#allocation6], 1 }
 0x174   :  { %395 = vsyncpa [#allocation4], 1 }
 0x175   :  { %397 = vsyncpa [#allocation4 + $0x1], 1 }

</bundles_post_ra>
